<compile_context>
chip_gen: v7x
topology: tpu7x:2x2x1
jax: 0.10.0
libtpu: 0.0.40
codegen_flags: <defaults>
</compile_context>

<pallas_src>
import functools

import jax
import jax.numpy as jnp
import numpy as np
from jax.experimental import pallas as pl
from jax.experimental.pallas import tpu as pltpu


def _bottleneck_kernel(H,
                       x_ref, w1_ref, w2_ref, w3_ref,
                       s1_ref, b1_ref, s2_ref, b2_ref, s3_ref, b3_ref,
                       out_ref):
    """Fused Bottleneck forward for B_blk images per grid step.

    x_ref / out_ref : lane-dense (B_blk*H, W*C) float32 slabs.
    w1_ref          : (W*CIN, W*P)   block-diagonal 1x1 conv weight.
    w2_ref          : (3, W*P, W*P)  banded 3x3 conv weights (one per dy tap).
    w3_ref          : (W*P, W*COUT)  block-diagonal 1x1 conv weight.
    s*/b*           : BN scale/bias tiled to lane-dense width (1, W*C).
    """
    x = x_ref[...]                                            # (BH, W*CIN)

    # ---- conv1 (1x1) + BN1 + ReLU  (block-diagonal weight) -----------------
    o1 = jnp.dot(x, w1_ref[...], preferred_element_type=jnp.float32)
    o1 = jnp.maximum(o1 * s1_ref[...] + b1_ref[...], 0.0)     # (BH, W*P)

    BH, WP = o1.shape

    # ---- conv2 (3x3, stride 1, pad 1) as three banded matmuls --------------
    # Row-shifted copies supply the dy = 0 / 2 taps; rows that crossed an
    # image boundary (and the outermost rows) are zeroed -> H zero padding.
    zrow = jnp.zeros((1, WP), jnp.float32)
    prev = jnp.concatenate([zrow, o1[:-1, :]], axis=0)        # row r <- o1[r-1]
    nxt = jnp.concatenate([o1[1:, :], zrow], axis=0)          # row r <- o1[r+1]
    row = jax.lax.broadcasted_iota(jnp.int32, (BH, WP), 0)
    prev = jnp.where(row % H == 0, 0.0, prev)                 # top border
    nxt = jnp.where(row % H == (H - 1), 0.0, nxt)             # bottom border

    # W-direction padding is already folded into the banded weights.
    o2 = jnp.dot(prev, w2_ref[0], preferred_element_type=jnp.float32)
    o2 = o2 + jnp.dot(o1, w2_ref[1], preferred_element_type=jnp.float32)
    o2 = o2 + jnp.dot(nxt, w2_ref[2], preferred_element_type=jnp.float32)
    o2 = jnp.maximum(o2 * s2_ref[...] + b2_ref[...], 0.0)     # (BH, W*P)

    # ---- conv3 (1x1) + BN3  (block-diagonal weight, lane-dense result) -----
    o3 = jnp.dot(o2, w3_ref[...], preferred_element_type=jnp.float32)
    o3 = o3 * s3_ref[...] + b3_ref[...]                       # (BH, W*COUT)

    # ---- residual add + ReLU, full-lane unmasked store ----------------------
    out_ref[...] = jnp.maximum(o3 + x, 0.0)


def _pick_batch_block(n, max_blk=8):
    """Largest divisor of n (<= max_blk) that still leaves >= 2 grid steps
    (so v7x's two TensorCores both get work)."""
    best = 1
    for cand in range(1, min(n, max_blk) + 1):
        if n % cand == 0 and (n // cand >= 2 or n == 1):
            best = cand
    return best


def bottleneck_forward(x_nhwc, w1, w2, w3, s1, b1, s2, b2, s3, b3,
                       batch_block=None):
    N, H, W, CIN = x_nhwc.shape
    P = w1.shape[1]
    COUT = w3.shape[1]
    assert COUT == CIN, "identity residual requires inplanes == planes * 4"

    B = batch_block if batch_block is not None else _pick_batch_block(N)
    assert N % B == 0, "batch block must divide N"
    assert (B * H) % 8 == 0, "block row count must be a multiple of 8"

    # Lane-dense 2-D view of the activations (contiguous row-major merge).
    x2d = x_nhwc.reshape(N * H, W * CIN)

    f32 = jnp.float32
    eye_w = jnp.eye(W, dtype=f32)
    # 1x1 convs -> block-diagonal weights operating on the lane-dense layout.
    w1_bd = jnp.kron(eye_w, w1.astype(f32))                       # (W*CIN, W*P)
    w3_bd = jnp.kron(eye_w, w3.astype(f32))                       # (W*P, W*COUT)
    # 3x3 conv -> banded weight per dy tap; band absence == zero W-padding.
    w2_band = jnp.stack([
        sum(jnp.kron(jnp.eye(W, k=1 - dx, dtype=f32), w2[dy, dx].astype(f32))
            for dx in range(3))
        for dy in range(3)])                                      # (3, W*P, W*P)

    # BN scale/bias tiled to lane-dense width.
    s1_t, b1_t = jnp.tile(s1, (1, W)), jnp.tile(b1, (1, W))       # (1, W*P)
    s2_t, b2_t = jnp.tile(s2, (1, W)), jnp.tile(b2, (1, W))       # (1, W*P)
    s3_t, b3_t = jnp.tile(s3, (1, W)), jnp.tile(b3, (1, W))       # (1, W*COUT)

    kernel = functools.partial(_bottleneck_kernel, H)

    out2d = pl.pallas_call(
        kernel,
        out_shape=jax.ShapeDtypeStruct((N * H, W * COUT), jnp.float32),
        grid_spec=pltpu.PrefetchScalarGridSpec(
            num_scalar_prefetch=0,
            grid=(N // B,),
            in_specs=[
                pl.BlockSpec((B * H, W * CIN), lambda b: (b, 0)),      # x
                pl.BlockSpec((W * CIN, W * P), lambda b: (0, 0)),      # w1 (bd)
                pl.BlockSpec((3, W * P, W * P), lambda b: (0, 0, 0)),  # w2 (band)
                pl.BlockSpec((W * P, W * COUT), lambda b: (0, 0)),     # w3 (bd)
                pl.BlockSpec((1, W * P), lambda b: (0, 0)),            # s1
                pl.BlockSpec((1, W * P), lambda b: (0, 0)),            # b1
                pl.BlockSpec((1, W * P), lambda b: (0, 0)),            # s2
                pl.BlockSpec((1, W * P), lambda b: (0, 0)),            # b2
                pl.BlockSpec((1, W * COUT), lambda b: (0, 0)),         # s3
                pl.BlockSpec((1, W * COUT), lambda b: (0, 0)),         # b3
            ],
            out_specs=pl.BlockSpec((B * H, W * COUT), lambda b: (b, 0)),
        ),
        compiler_params=pltpu.CompilerParams(
            dimension_semantics=("parallel",),
            vmem_limit_bytes=32 * 1024 * 1024),
    )(x2d, w1_bd, w2_band, w3_bd, s1_t, b1_t, s2_t, b2_t, s3_t, b3_t)

    return out2d.reshape(N, H, W, COUT)


# ----------------------------- reference (pure JAX) -----------------------------
def _ref_forward(x_nhwc, w1, w2, w3, s1, b1, s2, b2, s3, b3):
    dn = ("NHWC", "HWIO", "NHWC")
    c1 = jax.lax.conv_general_dilated(x_nhwc, w1.reshape(1, 1, *w1.shape),
                                      (1, 1), "VALID", dimension_numbers=dn)
    o1 = jnp.maximum(c1 * s1[0] + b1[0], 0.0)
    c2 = jax.lax.conv_general_dilated(o1, w2, (1, 1), "SAME",
                                      dimension_numbers=dn)
    o2 = jnp.maximum(c2 * s2[0] + b2[0], 0.0)
    c3 = jax.lax.conv_general_dilated(o2, w3.reshape(1, 1, *w3.shape),
                                      (1, 1), "VALID", dimension_numbers=dn)
    o3 = c3 * s3[0] + b3[0]
    return jnp.maximum(o3 + x_nhwc, 0.0)


def _fold_bn(gamma, beta, mean, var, eps=1e-5):
    scale = gamma / jnp.sqrt(var + eps)
    bias = beta - mean * scale
    return scale[None, :], bias[None, :]


if __name__ == "__main__":
    # Bottleneck(inplanes=16, planes=4, stride=1, downsample=None)
    N, H, W = 4, 16, 16
    planes = 4
    inplanes = planes * 4        # identity residual => inplanes == planes * expansion
    cout = planes * 4

    key = jax.random.PRNGKey(0)
    ks = jax.random.split(key, 16)

    # input (built NCHW like PyTorch, then transposed to NHWC for the kernel)
    x_nchw = jax.random.normal(ks[0], (N, inplanes, H, W), jnp.float32)
    x_nhwc = jnp.transpose(x_nchw, (0, 2, 3, 1))

    # conv weights (bias=False as in the module)
    w1 = jax.random.normal(ks[1], (inplanes, planes), jnp.float32) * 0.1
    w2 = jax.random.normal(ks[2], (3, 3, planes, planes), jnp.float32) * 0.1
    w3 = jax.random.normal(ks[3], (planes, cout), jnp.float32) * 0.1

    # BatchNorm params (eval mode, deterministic running stats), folded to scale/bias
    def bn_params(kg, kb, km, kv, c):
        gamma = 1.0 + 0.1 * jax.random.normal(kg, (c,), jnp.float32)
        beta = 0.1 * jax.random.normal(kb, (c,), jnp.float32)
        mean = 0.1 * jax.random.normal(km, (c,), jnp.float32)
        var = 1.0 + 0.1 * jax.random.uniform(kv, (c,), jnp.float32)
        return _fold_bn(gamma, beta, mean, var)

    s1, b1 = bn_params(ks[4], ks[5], ks[6], ks[7], planes)
    s2, b2 = bn_params(ks[8], ks[9], ks[10], ks[11], planes)
    s3, b3 = bn_params(ks[12], ks[13], ks[14], ks[15], cout)

    out = bottleneck_forward(x_nhwc, w1, w2, w3, s1, b1, s2, b2, s3, b3)
    out = jax.block_until_ready(out)

    ref = _ref_forward(x_nhwc, w1, w2, w3, s1, b1, s2, b2, s3, b3)
    np.testing.assert_allclose(np.asarray(out), np.asarray(ref),
                               rtol=1e-4, atol=1e-4)

    print("KERNEL_OK")
</pallas_src>

<mosaic_0001>
module attributes {stable_mosaic.version = 11 : i64} {
  func.func @_bottleneck_kernel(%arg0: i32, %arg1: memref<32x256xf32, #tpu.memory_space<vmem>>, %arg2: memref<256x64xf32, #tpu.memory_space<vmem>>, %arg3: memref<3x64x64xf32, #tpu.memory_space<vmem>>, %arg4: memref<64x256xf32, #tpu.memory_space<vmem>>, %arg5: memref<1x64xf32, #tpu.memory_space<vmem>>, %arg6: memref<1x64xf32, #tpu.memory_space<vmem>>, %arg7: memref<1x64xf32, #tpu.memory_space<vmem>>, %arg8: memref<1x64xf32, #tpu.memory_space<vmem>>, %arg9: memref<1x256xf32, #tpu.memory_space<vmem>>, %arg10: memref<1x256xf32, #tpu.memory_space<vmem>>, %arg11: memref<32x256xf32, #tpu.memory_space<vmem>>) attributes {dimension_semantics = [#tpu.dimension_semantics<parallel>], iteration_bounds = array<i64: 2>, scalar_prefetch = 0 : i64, scratch_operands = 0 : i64, tpu.core_type = #tpu.core_type<tc>, window_params = [{transform_indices = @transform_0, window_bounds = array<i64: 32, 256>}, {pipeline_mode = #tpu.pipeline_mode<synchronous>, transform_indices = @transform_1, window_bounds = array<i64: 256, 64>}, {pipeline_mode = #tpu.pipeline_mode<synchronous>, transform_indices = @transform_2, window_bounds = array<i64: 3, 64, 64>}, {pipeline_mode = #tpu.pipeline_mode<synchronous>, transform_indices = @transform_3, window_bounds = array<i64: 64, 256>}, {pipeline_mode = #tpu.pipeline_mode<synchronous>, transform_indices = @transform_4, window_bounds = array<i64: 1, 64>}, {pipeline_mode = #tpu.pipeline_mode<synchronous>, transform_indices = @transform_5, window_bounds = array<i64: 1, 64>}, {pipeline_mode = #tpu.pipeline_mode<synchronous>, transform_indices = @transform_6, window_bounds = array<i64: 1, 64>}, {pipeline_mode = #tpu.pipeline_mode<synchronous>, transform_indices = @transform_7, window_bounds = array<i64: 1, 64>}, {pipeline_mode = #tpu.pipeline_mode<synchronous>, transform_indices = @transform_8, window_bounds = array<i64: 1, 256>}, {pipeline_mode = #tpu.pipeline_mode<synchronous>, transform_indices = @transform_9, window_bounds = array<i64: 1, 256>}, {transform_indices = @transform_10, window_bounds = array<i64: 32, 256>}]} {
    %c0 = arith.constant 0 : index
    %c0_0 = arith.constant 0 : index
    %0 = vector.load %arg1[%c0, %c0_0] : memref<32x256xf32, #tpu.memory_space<vmem>>, vector<32x256xf32>
    %c0_1 = arith.constant 0 : index
    %c0_2 = arith.constant 0 : index
    %1 = vector.load %arg2[%c0_1, %c0_2] : memref<256x64xf32, #tpu.memory_space<vmem>>, vector<256x64xf32>
    %cst = arith.constant dense<0.000000e+00> : vector<32x64xf32>
    %2 = tpu.matmul %0, %1, %cst {dimension_numbers = #tpu.dot_dimension_numbers<[1], [0], [0], [1], [0, 0, 1, 1], [], []>} : vector<32x256xf32>, vector<256x64xf32>, vector<32x64xf32> -> vector<32x64xf32>
    %c0_3 = arith.constant 0 : index
    %c0_4 = arith.constant 0 : index
    %3 = vector.load %arg5[%c0_3, %c0_4] : memref<1x64xf32, #tpu.memory_space<vmem>>, vector<1x64xf32>
    %4 = vector.broadcast %3 : vector<1x64xf32> to vector<32x64xf32>
    %5 = arith.mulf %2, %4 : vector<32x64xf32>
    %c0_5 = arith.constant 0 : index
    %c0_6 = arith.constant 0 : index
    %6 = vector.load %arg6[%c0_5, %c0_6] : memref<1x64xf32, #tpu.memory_space<vmem>>, vector<1x64xf32>
    %7 = vector.broadcast %6 : vector<1x64xf32> to vector<32x64xf32>
    %8 = arith.addf %5, %7 : vector<32x64xf32>
    %cst_7 = arith.constant 0.000000e+00 : f32
    %9 = vector.broadcast %cst_7 : f32 to vector<32x64xf32>
    %10 = arith.maximumf %8, %9 : vector<32x64xf32>
    %cst_8 = arith.constant 0.000000e+00 : f32
    %11 = vector.broadcast %cst_8 : f32 to vector<1x64xf32>
    %12 = vector.extract_strided_slice %10 {offsets = [0, 0], sizes = [31, 64], strides = [1, 1]} : vector<32x64xf32> to vector<31x64xf32>
    %13 = tpu.concatenate %11, %12 in 0 : vector<1x64xf32>, vector<31x64xf32> -> vector<32x64xf32>
    %14 = vector.extract_strided_slice %10 {offsets = [1, 0], sizes = [31, 64], strides = [1, 1]} : vector<32x64xf32> to vector<31x64xf32>
    %15 = tpu.concatenate %14, %11 in 0 : vector<31x64xf32>, vector<1x64xf32> -> vector<32x64xf32>
    %16 = tpu.iota {dimensions = array<i32: 0>} : vector<32x64xi32>
    %c16_i32 = arith.constant 16 : i32
    %c0_i32 = arith.constant 0 : i32
    %17 = arith.cmpi eq, %c16_i32, %c0_i32 : i32
    %c1_i32 = arith.constant 1 : i32
    %18 = arith.select %17, %c1_i32, %c16_i32 : i32
    %19 = vector.broadcast %18 : i32 to vector<32x64xi32>
    %20 = arith.remsi %16, %19 : vector<32x64xi32>
    %c0_i32_9 = arith.constant 0 : i32
    %21 = vector.broadcast %c0_i32_9 : i32 to vector<32x64xi32>
    %22 = arith.cmpi ne, %20, %21 : vector<32x64xi32>
    %c0_i32_10 = arith.constant 0 : i32
    %23 = vector.broadcast %c0_i32_10 : i32 to vector<32x64xi32>
    %24 = arith.cmpi slt, %20, %23 : vector<32x64xi32>
    %c0_i32_11 = arith.constant 0 : i32
    %25 = arith.cmpi slt, %18, %c0_i32_11 : i32
    %26 = vector.broadcast %25 : i1 to vector<32x64xi1>
    %27 = vector.broadcast %26 : vector<32x64xi1> to vector<32x64xi1>
    %28 = arith.xori %24, %27 : vector<32x64xi1>
    %29 = arith.andi %28, %22 : vector<32x64xi1>
    %30 = vector.broadcast %18 : i32 to vector<32x64xi32>
    %31 = arith.addi %20, %30 : vector<32x64xi32>
    %32 = arith.select %29, %31, %20 : vector<32x64xi1>, vector<32x64xi32>
    %c0_i32_12 = arith.constant 0 : i32
    %33 = vector.broadcast %c0_i32_12 : i32 to vector<32x64xi32>
    %34 = arith.cmpi eq, %32, %33 : vector<32x64xi32>
    %cst_13 = arith.constant 0.000000e+00 : f32
    %35 = vector.broadcast %cst_13 : f32 to vector<32x64xf32>
    %36 = arith.select %34, %35, %13 : vector<32x64xi1>, vector<32x64xf32>
    %c16_i32_14 = arith.constant 16 : i32
    %c0_i32_15 = arith.constant 0 : i32
    %37 = arith.cmpi eq, %c16_i32_14, %c0_i32_15 : i32
    %c1_i32_16 = arith.constant 1 : i32
    %38 = arith.select %37, %c1_i32_16, %c16_i32_14 : i32
    %39 = vector.broadcast %38 : i32 to vector<32x64xi32>
    %40 = arith.remsi %16, %39 : vector<32x64xi32>
    %c0_i32_17 = arith.constant 0 : i32
    %41 = vector.broadcast %c0_i32_17 : i32 to vector<32x64xi32>
    %42 = arith.cmpi ne, %40, %41 : vector<32x64xi32>
    %c0_i32_18 = arith.constant 0 : i32
    %43 = vector.broadcast %c0_i32_18 : i32 to vector<32x64xi32>
    %44 = arith.cmpi slt, %40, %43 : vector<32x64xi32>
    %c0_i32_19 = arith.constant 0 : i32
    %45 = arith.cmpi slt, %38, %c0_i32_19 : i32
    %46 = vector.broadcast %45 : i1 to vector<32x64xi1>
    %47 = vector.broadcast %46 : vector<32x64xi1> to vector<32x64xi1>
    %48 = arith.xori %44, %47 : vector<32x64xi1>
    %49 = arith.andi %48, %42 : vector<32x64xi1>
    %50 = vector.broadcast %38 : i32 to vector<32x64xi32>
    %51 = arith.addi %40, %50 : vector<32x64xi32>
    %52 = arith.select %49, %51, %40 : vector<32x64xi1>, vector<32x64xi32>
    %c15_i32 = arith.constant 15 : i32
    %53 = vector.broadcast %c15_i32 : i32 to vector<32x64xi32>
    %54 = arith.cmpi eq, %52, %53 : vector<32x64xi32>
    %cst_20 = arith.constant 0.000000e+00 : f32
    %55 = vector.broadcast %cst_20 : f32 to vector<32x64xf32>
    %56 = arith.select %54, %55, %15 : vector<32x64xi1>, vector<32x64xf32>
    %c0_21 = arith.constant 0 : index
    %c0_22 = arith.constant 0 : index
    %c0_23 = arith.constant 0 : index
    %57 = vector.load %arg3[%c0_21, %c0_22, %c0_23] : memref<3x64x64xf32, #tpu.memory_space<vmem>>, vector<1x64x64xf32>
    %58 = vector.shape_cast %57 : vector<1x64x64xf32> to vector<64x64xf32>
    %cst_24 = arith.constant dense<0.000000e+00> : vector<32x64xf32>
    %59 = tpu.matmul %36, %58, %cst_24 {dimension_numbers = #tpu.dot_dimension_numbers<[1], [0], [0], [1], [0, 0, 1, 1], [], []>} : vector<32x64xf32>, vector<64x64xf32>, vector<32x64xf32> -> vector<32x64xf32>
    %c1 = arith.constant 1 : index
    %c0_25 = arith.constant 0 : index
    %c0_26 = arith.constant 0 : index
    %60 = vector.load %arg3[%c1, %c0_25, %c0_26] : memref<3x64x64xf32, #tpu.memory_space<vmem>>, vector<1x64x64xf32>
    %61 = vector.shape_cast %60 : vector<1x64x64xf32> to vector<64x64xf32>
    %cst_27 = arith.constant dense<0.000000e+00> : vector<32x64xf32>
    %62 = tpu.matmul %10, %61, %cst_27 {dimension_numbers = #tpu.dot_dimension_numbers<[1], [0], [0], [1], [0, 0, 1, 1], [], []>} : vector<32x64xf32>, vector<64x64xf32>, vector<32x64xf32> -> vector<32x64xf32>
    %63 = arith.addf %59, %62 : vector<32x64xf32>
    %c2 = arith.constant 2 : index
    %c0_28 = arith.constant 0 : index
    %c0_29 = arith.constant 0 : index
    %64 = vector.load %arg3[%c2, %c0_28, %c0_29] : memref<3x64x64xf32, #tpu.memory_space<vmem>>, vector<1x64x64xf32>
    %65 = vector.shape_cast %64 : vector<1x64x64xf32> to vector<64x64xf32>
    %cst_30 = arith.constant dense<0.000000e+00> : vector<32x64xf32>
    %66 = tpu.matmul %56, %65, %cst_30 {dimension_numbers = #tpu.dot_dimension_numbers<[1], [0], [0], [1], [0, 0, 1, 1], [], []>} : vector<32x64xf32>, vector<64x64xf32>, vector<32x64xf32> -> vector<32x64xf32>
    %67 = arith.addf %63, %66 : vector<32x64xf32>
    %c0_31 = arith.constant 0 : index
    %c0_32 = arith.constant 0 : index
    %68 = vector.load %arg7[%c0_31, %c0_32] : memref<1x64xf32, #tpu.memory_space<vmem>>, vector<1x64xf32>
    %69 = vector.broadcast %68 : vector<1x64xf32> to vector<32x64xf32>
    %70 = arith.mulf %67, %69 : vector<32x64xf32>
    %c0_33 = arith.constant 0 : index
    %c0_34 = arith.constant 0 : index
    %71 = vector.load %arg8[%c0_33, %c0_34] : memref<1x64xf32, #tpu.memory_space<vmem>>, vector<1x64xf32>
    %72 = vector.broadcast %71 : vector<1x64xf32> to vector<32x64xf32>
    %73 = arith.addf %70, %72 : vector<32x64xf32>
    %cst_35 = arith.constant 0.000000e+00 : f32
    %74 = vector.broadcast %cst_35 : f32 to vector<32x64xf32>
    %75 = arith.maximumf %73, %74 : vector<32x64xf32>
    %c0_36 = arith.constant 0 : index
    %c0_37 = arith.constant 0 : index
    %76 = vector.load %arg4[%c0_36, %c0_37] : memref<64x256xf32, #tpu.memory_space<vmem>>, vector<64x256xf32>
    %cst_38 = arith.constant dense<0.000000e+00> : vector<32x256xf32>
    %77 = tpu.matmul %75, %76, %cst_38 {dimension_numbers = #tpu.dot_dimension_numbers<[1], [0], [0], [1], [0, 0, 1, 1], [], []>} : vector<32x64xf32>, vector<64x256xf32>, vector<32x256xf32> -> vector<32x256xf32>
    %c0_39 = arith.constant 0 : index
    %c0_40 = arith.constant 0 : index
    %78 = vector.load %arg9[%c0_39, %c0_40] : memref<1x256xf32, #tpu.memory_space<vmem>>, vector<1x256xf32>
    %79 = vector.broadcast %78 : vector<1x256xf32> to vector<32x256xf32>
    %80 = arith.mulf %77, %79 : vector<32x256xf32>
    %c0_41 = arith.constant 0 : index
    %c0_42 = arith.constant 0 : index
    %81 = vector.load %arg10[%c0_41, %c0_42] : memref<1x256xf32, #tpu.memory_space<vmem>>, vector<1x256xf32>
    %82 = vector.broadcast %81 : vector<1x256xf32> to vector<32x256xf32>
    %83 = arith.addf %80, %82 : vector<32x256xf32>
    %84 = arith.addf %83, %0 : vector<32x256xf32>
    %cst_43 = arith.constant 0.000000e+00 : f32
    %85 = vector.broadcast %cst_43 : f32 to vector<32x256xf32>
    %86 = arith.maximumf %84, %85 : vector<32x256xf32>
    %c0_44 = arith.constant 0 : index
    %c0_45 = arith.constant 0 : index
    %87 = vector.load %arg11[%c0_44, %c0_45] : memref<32x256xf32, #tpu.memory_space<vmem>>, vector<32x256xf32>
    tpu.vector_store %arg11[%c0_44, %c0_45], %86 {strides = array<i32>} : memref<32x256xf32, #tpu.memory_space<vmem>>, vector<32x256xf32>,
    return
  }
  func.func @transform_0(%arg0: i32) -> (i32, i32) {
    %c0_i32 = arith.constant 0 : i32
    %c0_i32_0 = arith.constant 0 : i32
    return %arg0, %c0_i32 : i32, i32
  }
  func.func @transform_1(%arg0: i32) -> (i32, i32) {
    %c0_i32 = arith.constant 0 : i32
    %c0_i32_0 = arith.constant 0 : i32
    %c0_i32_1 = arith.constant 0 : i32
    return %c0_i32, %c0_i32_0 : i32, i32
  }
  func.func @transform_2(%arg0: i32) -> (i32, i32, i32) {
    %c0_i32 = arith.constant 0 : i32
    %c0_i32_0 = arith.constant 0 : i32
    %c0_i32_1 = arith.constant 0 : i32
    %c0_i32_2 = arith.constant 0 : i32
    return %c0_i32, %c0_i32_0, %c0_i32_1 : i32, i32, i32
  }
  func.func @transform_3(%arg0: i32) -> (i32, i32) {
    %c0_i32 = arith.constant 0 : i32
    %c0_i32_0 = arith.constant 0 : i32
    %c0_i32_1 = arith.constant 0 : i32
    return %c0_i32, %c0_i32_0 : i32, i32
  }
  func.func @transform_4(%arg0: i32) -> (i32, i32) {
    %c0_i32 = arith.constant 0 : i32
    %c0_i32_0 = arith.constant 0 : i32
    %c0_i32_1 = arith.constant 0 : i32
    return %c0_i32, %c0_i32_0 : i32, i32
  }
  func.func @transform_5(%arg0: i32) -> (i32, i32) {
    %c0_i32 = arith.constant 0 : i32
    %c0_i32_0 = arith.constant 0 : i32
    %c0_i32_1 = arith.constant 0 : i32
    return %c0_i32, %c0_i32_0 : i32, i32
  }
  func.func @transform_6(%arg0: i32) -> (i32, i32) {
    %c0_i32 = arith.constant 0 : i32
    %c0_i32_0 = arith.constant 0 : i32
    %c0_i32_1 = arith.constant 0 : i32
    return %c0_i32, %c0_i32_0 : i32, i32
  }
  func.func @transform_7(%arg0: i32) -> (i32, i32) {
    %c0_i32 = arith.constant 0 : i32
    %c0_i32_0 = arith.constant 0 : i32
    %c0_i32_1 = arith.constant 0 : i32
    return %c0_i32, %c0_i32_0 : i32, i32
  }
  func.func @transform_8(%arg0: i32) -> (i32, i32) {
    %c0_i32 = arith.constant 0 : i32
    %c0_i32_0 = arith.constant 0 : i32
    %c0_i32_1 = arith.constant 0 : i32
    return %c0_i32, %c0_i32_0 : i32, i32
  }
  func.func @transform_9(%arg0: i32) -> (i32, i32) {
    %c0_i32 = arith.constant 0 : i32
    %c0_i32_0 = arith.constant 0 : i32
    %c0_i32_1 = arith.constant 0 : i32
    return %c0_i32, %c0_i32_0 : i32, i32
  }
  func.func @transform_10(%arg0: i32) -> (i32, i32) {
    %c0_i32 = arith.constant 0 : i32
    %c0_i32_0 = arith.constant 0 : i32
    return %arg0, %c0_i32 : i32, i32
  }
}

</mosaic_0001>

<bundles_post_ra>
// kernel: tpu_custom_call.1
= control target key start
LH: loop header
LB: loop body
LE: loop exit
PB: predicated region body
PF: predicated region fallthrough
CT: control target
= control target key end

     0   :  { %s2173_s0 = inlined_call_operand.vmem [shape: f32[64,256], index: 0, kind: input, shape index: {}]   ;;  %s2174_s1 = inlined_call_operand.vmem [shape: f32[256,64], index: 1, kind: input, shape index: {}]   ;;  %s2175_s2 = inlined_call_operand.vmem [shape: f32[3,64,64], index: 2, kind: input, shape index: {}]   ;;  %s2176_s3 = inlined_call_operand.hbm [shape: f32[64,256], index: 3, kind: input, shape index: {}]   ;;  %s2177_s4 = inlined_call_operand.vmem [shape: f32[1,64], index: 4, kind: input, shape index: {}]   ;;  %s2178_s5 = inlined_call_operand.vmem [shape: f32[1,64], index: 5, kind: input, shape index: {}]   ;;  %s2179_s6 = inlined_call_operand.vmem [shape: f32[1,64], index: 6, kind: input, shape index: {}]   ;;  %s2180_s7 = inlined_call_operand.vmem [shape: f32[1,64], index: 7, kind: input, shape index: {}]   ;;  %s2181_s8 = inlined_call_operand.vmem [shape: f32[1,256], index: 8, kind: input, shape index: {}]   ;;  %s2182_s9 = inlined_call_operand.vmem [shape: f32[1,256], index: 9, kind: input, shape index: {}]   ;;  %s2183_s10 = inlined_call_operand.hbm [shape: f32[64,256], index: 10, kind: output, shape index: {}]  }
   0x1   :  { %2187 = sst [smem:[#allocation8_spill]] %s2176_s3 }
   0x2   :  { %15 = vsyncpa [#allocation3], 0 }
   0x3   :  { %16 = vsyncpa [#allocation4], 0 }
   0x4   :  { %18 = vsyncpa [#allocation4 + $0x1], 0  ;;  %s1761_s13 = smov 0   ;;  %s1763_s14 = smov 0  }
   0x5   :  { %s1765_s15 = smov 0   ;;  %s1767_s16 = smov 0  }
   0x6 LB: > { %s1782_s17 = sadd.s32 4294967295, %s1697_s16   ;;  %s1243_s18 = sadd.s32 4294967294, %s1697_s16   ;;  %s1697_s16 = sphi %s1767_s16, %s2201_s16   ;;  %s1693_s15 = sphi %s1765_s15, %s2200_s15   ;;  %s1689_s14 = sphi %s1763_s14, %s2199_s14   ;;  %s1685_s13 = sphi %s1761_s13, %s2198_s13  }
   0x7   : > { %s1786_s19 = sadd.s32 1, %s1697_s16   ;;  %s246_s20 = sadd.s32 1, %s1693_s15 }
   0x8   : > { %s243_s21 = ssub.s32 %s1697_s16, %s1786_s19  ;;  %p256_p0 = scmp.ne.s32.totalorder %s1693_s15, %s1689_s14 }
   0x9   : > { %p244_p1 = scmp.eq.s32.totalorder %s243_s21, 0  ;;  %p257_p2 = scmp.eq.s32.totalorder %s1782_s17, 1 }
   0xa   : > { %p262_p3 = scmp.ne.s32.totalorder %s1689_s14, %s1685_s13  ;;  %p263_p4 = scmp.eq.s32.totalorder %s1243_s18, 1 }
   0xb   : > { %s1797_s22 = scalar_select %p244_p1, %s1693_s15, %s246_s20  }
   0xc   : > { %p1799_p5 = por %p257_p2, %p256_p0  ;;  %p1803_p6 = por %p263_p4, %p262_p3 }
   0xd   : > { %p1244_p7 = scmp.ge.s32.totalorder %s1697_s16, 1  ;;  %p270_p8 = scmp.lt.s32.totalorder %s1697_s16, 3 }
   0xe   : > { %s2188_s23 = scalar_select %p1799_p5, 1, 0 }
   0xf   : > { %s2189_s24 = scalar_select %p1803_p6, 1, 0 }
  0x10   : > { %p2184_p9 = scmp.eq.s32.totalorder %s1782_s17, 0  ;;  %p1810_p10 = pnand %p1244_p7, %p270_p8 }
  0x11   : > { %s1699_s26 = smov [#allocation2]   ;;  %s2192_s3 = sld [smem:[#allocation8_spill]] }
  0x12   : > { %s2190_s25 = scalar_select %p1810_p10, 1, 0 }
  0x13   : > { %s288_s27 = sshll.u32 %s1699_s26, 4  ;;  %p1554_p11 = pneg %p1810_p10  ;;  %s289_s27 = int_to_ptr.vmem [resolvable:$true] %s288_s27 }
  0x15   : > { %p1818_p12 = pnand %p2184_p9, %p1554_p11 }
  0x17   : > { %s1603_s11 = scalar_lea.hbm %s2192_s3, 2048  ;;  %p1605_p0 = pneg %p1818_p12 }
  0x18   : > { %p1604_p13 = scmp.ne.s32.totalorder %s2192_s3, %s1603_s11  ;;  %p1610_p3 = scmp.lt.u32.totalorder %s1603_s11, %s2192_s3 }
  0x1a   : > { %p1606_p1 = pnand %p1605_p0, %p1604_p13 }
  0x1c   : > { %p1607_p2 = pneg %p1606_p1 }
  0x1e   : > { %p1612_p4 = pnand %p1610_p3, %p1607_p2 }
  0x20   : > { %1615 = shalt.err (!%p1612_p4)
}
  0x21   : > { %s1616_s26 = scalar_lea.vmem %s289_s27, 2048  ;;  %p1624_p9 = scmp.lt.s32.totalorder %s289_s27, %s289_s27 }
  0x22   : > { %p1617_p7 = scmp.ne.s32.totalorder %s289_s27, %s1616_s26  ;;  %p1625_p6 = scmp.lt.s32.totalorder %s1616_s26, %s1616_s26 }
  0x24   : > { %p1619_p8 = pnand %p1617_p7, %p1605_p0  ;;  %p1626_p5 = por %p1625_p6, %p1624_p9 }
  0x26   : > { %p1620_p11 = pneg %p1619_p8 }
  0x28   : > { %p1627_p10 = pnand %p1626_p5, %p1620_p11 }
  0x2a   : > { %1630 = shalt.err (!%p1627_p10)
}
  0x2b   : > { %s1700_s29 = smov 256   ;;  %s1701_s30 = smov 16  }
  0x2c   : > { %1557 = dma.hbm_to_vmem [thread:$0]  (!%p1818_p12), %s2192_s3, 2048, %s289_s27, [#allocation3], %s1700_s29, %s1700_s29, %s1701_s30  }
  0x2d   : > { %p2193_p13 = scmp.ne.s32.totalorder %s2190_s25, 0 }
  0x2e   : > { %p2194_p1 = scmp.eq.s32.totalorder (!%p2193_p13), %s1782_s17, 0 }
  0x2f   : > { %332 = sbr.rel (%p2193_p13) target bundleno = 814 (0x32e), region = 60 }
  0x36   : > { %1676 = dma.done.wait (%p2194_p1), [#allocation3], 2048   ;;  %p2195_p0 = pmov %p2194_p1 }
  0x37   : > { %s1250_s11 = sshll.u32 %s1782_s17, 2  ;;  %v403_v0 = vld [vmem:[%s2174_s1 + $0x80] sm:$0xff]  ;;  %v404_v1 = vld [vmem:[%s2174_s1 + $0x88] sm:$0xff]  ;;  %v405_v5 = vld [vmem:[%s2174_s1 + $0x90] sm:$0xff]  ;;  %vm646_vm0 = vcmask 523264   ;;  %vm547_vm1 = vcmask 1046528  }
  0x38   : > { %1678 = vsyncadd (%p2195_p0), [#allocation3], 4294965248  ;;  %p372_p5 = scmp.lt.s32.totalorder %s1250_s11, 7  ;;  %v387_v2 = vld [vmem:[%s2174_s1] sm:$0xff]  ;;  %v1444_v3 = vpack.c.bf16 %v404_v1, %v403_v0  ;;  %v388_v4 = vld [vmem:[%s2174_s1 + $0x8] sm:$0xff]  ;;  %vm534_vm2 = vcmask 1040384  }
  0x39   : > { %v406_v6 = vld [vmem:[%s2174_s1 + $0x98] sm:$0xff]  ;;  %v1446_v7 = vpack.c.bf16 %v388_v4, %v387_v2  ;;  %v389_v9 = vld [vmem:[%s2174_s1 + $0x10] sm:$0xff]  ;;  %v407_v11 = vld [vmem:[%s2174_s1 + $0xa0] sm:$0xff]  ;;  %s368_s27 = sand.u32 1, %s1689_s14   ;;  %s1297_s30 = sshll.u32 %s1782_s17, 10 }
  0x3a   : > { %s2203_s11 = smov (!%p372_p5, %s1250_s11), 7  ;;  %v1448_v8 = vpack.c.bf16 %v406_v6, %v405_v5  ;;  %v390_v10 = vld [vmem:[%s2174_s1 + $0x18] sm:$0xff]  ;;  %1445 = vmatprep.subr.bf16.mxu0 %v1444_v3  ;;  %v408_v12 = vld [vmem:[%s2174_s1 + $0xa8] sm:$0xff]  ;;  %v391_v15 = vld [vmem:[%s2174_s1 + $0x20] sm:$0xff]  ;;  %s1249_s25 = sshll.u32 %s368_s27, 6 }
  0x3b   : > { %1447 = vmatpush3.bf16.msra.mxu0 %v1446_v7  ;;  %v1450_v13 = vpack.c.bf16 %v390_v10, %v389_v9  ;;  %s1295_s20 = sshll.u32 %s2203_s11, 4  ;;  %v1452_v14 = vpack.c.bf16 %v408_v12, %v407_v11  ;;  %v392_v16 = vld [vmem:[%s2174_s1 + $0x28] sm:$0xff]  ;;  %v409_v17 = vld [vmem:[%s2174_s1 + $0xb0] sm:$0xff]  ;;  %v410_v18 = vld [vmem:[%s2174_s1 + $0xb8] sm:$0xff]  ;;  %s2105_s29 = scalar_lea.vmem [#allocation5], %s1249_s25 }
  0x3c   : > { %1449 = vmatprep.subr.bf16.mxu0 %v1448_v8  ;;  %s1890_s3 = scalar_lea.vmem %s2173_s0, %s1295_s20  ;;  %v1454_v19 = vpack.c.bf16 %v392_v16, %v391_v15  ;;  %v1456_v20 = vpack.c.bf16 %v410_v18, %v409_v17  ;;  %v393_v21 = vld [vmem:[%s2174_s1 + $0x30] sm:$0xff]  ;;  %v394_v22 = vld [vmem:[%s2174_s1 + $0x38] sm:$0xff]  ;;  %v411_v23 = vld [vmem:[%s2174_s1 + $0xc0] sm:$0xff]  ;;  %s1169_s20 = sshll.u32 %s2105_s29, 4  ;;  %s2126_s20 = int_to_ptr.vmem [resolvable:$true] %s1169_s20 }
  0x3d   : > { %v412_v24 = vld [vmem:[%s2174_s1 + $0xc8] sm:$0xff]  ;;  %v1458_v26 = vpack.c.bf16 %v394_v22, %v393_v21  ;;  %v395_v27 = vld [vmem:[%s2174_s1 + $0x40] sm:$0xff]  ;;  %v413_v32 = vld [vmem:[%s2174_s1 + $0xd0] sm:$0xff]  ;;  %s2124_s11 = scalar_lea.hbm %s2183_s10, %s1297_s30  ;;  %s2132_s17 = scalar_lea.sflag [#allocation4], %s368_s27 }
  0x3e   : > { %v1905_v25 = vld [vmem:[%s1890_s3 + $0x8] sm:$0xff]  ;;  %v1460_v28 = vpack.c.bf16 %v412_v24, %v411_v23  ;;  %v1255_v30 = vld [vmem:[%s2175_s2 + $0x40] sm:$0xff]  ;;  %v414_v33 = vld [vmem:[%s2174_s1 + $0xd8] sm:$0xff]  ;;  %s1631_s21 = scalar_lea.vmem %s2126_s20, 1024  ;;  %p2196_p9 = scmp.ne.s32.totalorder %s2188_s23, 0 }
  0x3f   : > { %1451 = vmatpush3.bf16.msra.mxu0 %v1450_v13  ;;  %483 = vmatprep.mubr.f32.mxu0 %v1905_v25  ;;  %v396_v29 = vld [vmem:[%s2174_s1 + $0x48] sm:$0xff]  ;;  %v1464_v36 = vpack.c.bf16 %v414_v33, %v413_v32  ;;  %v397_v37 = vld [vmem:[%s2174_s1 + $0x50] sm:$0xff]  ;;  %v398_v38 = vld [vmem:[%s2174_s1 + $0x58] sm:$0xff]  ;;  %v560_v33 = vlaneseq  ;;  %p1632_p6 = scmp.ne.s32.totalorder %s2126_s20, %s1631_s21  ;;  %s1703_s28 = smov [#allocation5]  }
  0x40   : > { %1453 = vmatprep.subr.bf16.mxu0 %v1452_v14  ;;  %v1256_v31 = vld [vmem:[%s2175_s2 + $0x48] sm:$0xff]  ;;  %v1462_v35 = vpack.c.bf16 %v396_v29, %v395_v27  ;;  %v415_v39 = vld [vmem:[%s2174_s1 + $0xe0] sm:$0xff]  ;;  %v1466_v41 = vpack.c.bf16 %v398_v38, %v397_v37  ;;  %v417_v45 = vld [vmem:[%s2174_s1 + $0xf0] sm:$0xff]  ;;  %s1635_s26 = sshll.u32 %s1703_s28, 4  ;;  %s1636_s26 = int_to_ptr.vmem [resolvable:$false] %s1635_s26 }
  0x41   : > { %v1476_v34 = vpack.c.bf16 %v1256_v31, %v1255_v30  ;;  %v416_v40 = vld [vmem:[%s2174_s1 + $0xe8] sm:$0xff]  ;;  %v399_v43 = vld [vmem:[%s2174_s1 + $0x60] sm:$0xff]  ;;  %v418_v46 = vld [vmem:[%s2174_s1 + $0xf8] sm:$0xff]  ;;  %p1633_p10 = pnand %p1632_p6, %p2196_p9  ;;  %p1638_p2 = scmp.lt.s32.totalorder %s2126_s20, %s1636_s26 }
  0x42   : > { %v1468_v42 = vpack.c.bf16 %v416_v40, %v415_v39  ;;  %v400_v44 = vld [vmem:[%s2174_s1 + $0x68] sm:$0xff]  ;;  %v1472_v48 = vpack.c.bf16 %v418_v46, %v417_v45  ;;  %v401_v49 = vld [vmem:[%s2174_s1 + $0x70] sm:$0xff]  ;;  %v402_v50 = vld [vmem:[%s2174_s1 + $0x78] sm:$0xff] }
  0x43   : > { %1455 = vmatpush3.bf16.msra.mxu0 %v1454_v19  ;;  %1477 = vmatprep.subr.bf16.mxu1 %v1476_v34  ;;  %v1470_v47 = vpack.c.bf16 %v400_v44, %v399_v43  ;;  %v1474_v51 = vpack.c.bf16 %v402_v50, %v401_v49  ;;  %v1957_v52 = vld [vmem:[%s1890_s3] sm:$0xff]  ;;  %v1960_v53 = vld [vmem:[%s1890_s3 + $0x18] sm:$0xff]  ;;  %v1965_v54 = vld [vmem:[%s1890_s3 + $0x10] sm:$0xff]  ;;  %p1634_p12 = pneg %p1633_p10 }
  0x44   : > { %1457 = vmatprep.subr.bf16.mxu0 %v1456_v20  ;;  %1479 = vmatpush3.bf16.msra.mxu1 %v1476_v34  ;;  %v1968_v55 = vld [vmem:[%s1890_s3 + $0x28] sm:$0xff]  ;;  %v1973_v56 = vld [vmem:[%s1890_s3 + $0x20] sm:$0xff]  ;;  %v1976_v57 = vld [vmem:[%s1890_s3 + $0x38] sm:$0xff] }
  0x45   : > { %v1981_v58 = vld [vmem:[%s1890_s3 + $0x30] sm:$0xff]  ;;  %v1258_v60 = vld [vmem:[%s2175_s2 + $0x58] sm:$0xff]  ;;  %v1259_v62 = vld [vmem:[%s2175_s2 + $0x60] sm:$0xff]  ;;  %s1637_s3 = scalar_lea.vmem %s1636_s26, 2048 }
  0x46   : > { %v1257_v59 = vld [vmem:[%s2175_s2 + $0x50] sm:$0xff]  ;;  %v1260_v63 = vld [vmem:[%s2175_s2 + $0x68] sm:$0xff]  ;;  %v1262_v2 = vld [vmem:[%s2175_s2 + $0x78] sm:$0xff]  ;;  %p1639_p3 = scmp.lt.s32.totalorder %s1637_s3, %s1631_s21 }
  0x47   : > { %1459 = vmatpush3.bf16.msra.mxu0 %v1458_v26  ;;  %v1480_v61 = vpack.c.bf16 %v1258_v60, %v1257_v59  ;;  %v1484_v0 = vpack.c.bf16 %v1260_v63, %v1259_v62  ;;  %v1261_v1 = vld [vmem:[%s2175_s2 + $0x70] sm:$0xff]  ;;  %v629_v4 = vld [vmem:[%s2175_s2] sm:$0xff]  ;;  %v630_v5 = vld [vmem:[%s2175_s2 + $0x8] sm:$0xff] }
  0x48   : > { %1461 = vmatprep.subr.bf16.mxu0 %v1460_v28  ;;  %v1488_v3 = vpack.c.bf16 %v1262_v2, %v1261_v1  ;;  %v1492_v6 = vpack.c.bf16 %v630_v5, %v629_v4  ;;  %v974_v7 = vld [vmem:[#allocation2 + $0x8] sm:$0xff]  ;;  %v976_v8 = vld [vmem:[#allocation2 + $0x18] sm:$0xff]  ;;  %v973_v9 = vld [vmem:[#allocation2] sm:$0xff]  ;;  %p1640_p4 = por %p1639_p3, %p1638_p2 }
  0x49   : > { %1481 = vmatprep.subr.bf16.mxu1 %v1480_v61  ;;  %v1524_v10 = vpack.c.bf16 %v976_v8, %v974_v7  ;;  %v975_v11 = vld [vmem:[#allocation2 + $0x10] sm:$0xff]  ;;  %v978_v12 = vld [vmem:[#allocation2 + $0x28] sm:$0xff]  ;;  %v980_v13 = vld [vmem:[#allocation2 + $0x38] sm:$0xff] }
  0x4a   : > { %1483 = vmatpush3.bf16.msra.mxu1 %v1480_v61  ;;  %v1526_v14 = vpack.c.bf16 %v975_v11, %v973_v9  ;;  %v1528_v15 = vpack.c.bf16 %v980_v13, %v978_v12  ;;  %v977_v16 = vld [vmem:[#allocation2 + $0x20] sm:$0xff]  ;;  %v979_v17 = vld [vmem:[#allocation2 + $0x30] sm:$0xff]  ;;  %v982_v18 = vld [vmem:[#allocation2 + $0x48] sm:$0xff]  ;;  %p1641_p7 = pnand %p1640_p4, %p1634_p12 }
  0x4b   : > { %1463 = vmatpush3.bf16.msra.mxu0 %v1462_v35  ;;  %1485 = vmatprep.subr.bf16.mxu1 %v1484_v0  ;;  %v984_v19 = vld [vmem:[#allocation2 + $0x58] sm:$0xff]  ;;  %v1530_v20 = vpack.c.bf16 %v979_v17, %v977_v16  ;;  %v1253_v24 = vld [vmem:[%s2177_s4] ss:$0 sm:$0xff]  ;;  %v631_v38 = vld [vmem:[%s2175_s2 + $0x10] sm:$0xff] }
  0x4c   : > { %1465 = vmatprep.subr.bf16.mxu0 %v1464_v36  ;;  %v1532_v21 = vpack.c.bf16 %v984_v19, %v982_v18  ;;  %v1254_v27 = vld [vmem:[%s2178_s5] ss:$0 sm:$0xff]  ;;  %v632_v39 = vld [vmem:[%s2175_s2 + $0x18] sm:$0xff]  ;;  %v635_v5 = vld [vmem:[%s2175_s2 + $0x30] sm:$0xff] }
  0x4d   : > { %v1496_v46 = vpack.c.bf16 %v632_v39, %v631_v38  ;;  %v636_v7 = vld [vmem:[%s2175_s2 + $0x38] sm:$0xff]  ;;  %v1271_v16 = vld [vmem:[%s2175_s2 + $0x80] sm:$0xff]  ;;  %v1272_v17 = vld [vmem:[%s2175_s2 + $0x88] sm:$0xff] }
  0x4e   : > { %1487 = vmatpush3.bf16.msra.mxu1 %v1484_v0  ;;  %v1504_v13 = vpack.c.bf16 %v636_v7, %v635_v5 }
  0x4f   : > { %1467 = vmatpush3.bf16.msra.mxu0 %v1466_v41  ;;  %1489 = vmatprep.subr.bf16.mxu1 %v1488_v3 }
  0x50   : > { %1469 = vmatprep.subr.bf16.mxu0 %v1468_v42  ;;  %v2021_v42 = vshrl.u32 %v560_v33, 7  ;;  %v1277_v33 = vld [vmem:[%s2175_s2 + $0xb0] sm:$0xff] }
  0x52   : > { %1491 = vmatpush3.bf16.msra.mxu1 %v1488_v3  ;;  %v569_v0 = vand.u32 15, %v2021_v42  ;;  %v563_v11 = vadd.s32 16, %v2021_v42  ;;  %v564_v38 = vadd.s32 24, %v2021_v42 }
  0x53   : > { %1471 = vmatpush3.bf16.msra.mxu0 %v1470_v47  ;;  %1493 = vmatprep.subr.bf16.mxu1 %v1492_v6  ;;  %v633_v47 = vld [vmem:[%s2175_s2 + $0x20] sm:$0xff] }
  0x54   : > { %1473 = vmatprep.subr.bf16.mxu0 %v1472_v48  ;;  %v634_v48 = vld [vmem:[%s2175_s2 + $0x28] sm:$0xff]  ;;  %vm613_vm3 = vcmp.eq.s32.totalorder %v569_v0, 0  ;;  %v590_v39 = vand.u32 15, %v564_v38 }
  0x55   : > { %v1500_v63 = vpack.c.bf16 %v634_v48, %v633_v47  ;;  %v986_v47 = vld [vmem:[#allocation2 + $0x68] sm:$0xff]  ;;  %v988_v48 = vld [vmem:[#allocation2 + $0x78] sm:$0xff] }
  0x56   : > { %vm624_vm6 = vcmp.eq.s32.totalorder %v590_v39, 15 }
  0x57   : > { %1475 = vmatpush3.bf16.msra.mxu0 %v1474_v51 }
  0x58   : > { %1525 = vmatprep.subr.bf16.mxu0 %v1524_v10 }
  0x5a   : > { %484 = vmatmul.mubr.f32.vlgmr.msra.gmra.mrb[0].mxu0 %v1957_v52 }
  0x5b   : > { %488 = vmatprep.mubr.f32.mxu0 %v1960_v53  ;;  %1527 = vmatpush1.bf16.msra.mxu0 %v1526_v14 }
  0x5c   : > { %1529 = vmatprep.subr.bf16.mxu0 %v1528_v15 }
  0x5e   : > { %489 = vmatmul.mubr.f32.gmra.mrb[2].mxu0 %v1965_v54 }
  0x5f   : > { %493 = vmatprep.mubr.f32.mxu0 %v1968_v55  ;;  %1531 = vmatpush1.bf16.msra.mxu0 %v1530_v20 }
  0x60   : > { %1533 = vmatprep.subr.bf16.mxu0 %v1532_v21  ;;  %v583_v21 = vand.u32 15, %v563_v11 }
  0x62   : > { %494 = vmatmul.mubr.f32.gmra.mrb[4].mxu0 %v1973_v56  ;;  %vm615_vm4 = vcmp.eq.s32.totalorder %v583_v21, 0 }
  0x63   : > { %498 = vmatprep.mubr.f32.mxu0 %v1976_v57 }
  0x66   : > { %499 = vmatmul.mubr.f32.gmra.mrb[6].mxu0 %v1981_v58 }
 0x12d   : > { %v1330_v22 = vpop.f32.mrb[0].mxu0 }
 0x12e   : > { %v1331_v23 = vpop.f32.mrb[1].mxu0 }
 0x12f   : > { %v1332_v26 = vadd.f32 %v1331_v23, %v1330_v22  ;;  %v1508_v22 = vpack.c.bf16 %v1272_v17, %v1271_v16  ;;  %v1090_v16 = vld [vmem:[%s2181_s8] sm:$0x3]  ;;  %v1098_v17 = vsub.s32 1, %v2021_v42 }
 0x131   : > { %v511_v28 = vmul.f32 %v1332_v26, %v1253_v24  ;;  %v1333_v29 = vpop.f32.mrb[2].mxu0  ;;  %v1273_v26 = vld [vmem:[%s2175_s2 + $0x90] sm:$0xff] }
 0x132   : > { %v1334_v30 = vpop.f32.mrb[3].mxu0 }
 0x133   : > { %v1335_v31 = vadd.f32 %v1334_v30, %v1333_v29  ;;  %v522_v32 = vadd.f32 %v1254_v27, %v511_v28  ;;  %v1275_v29 = vld [vmem:[%s2175_s2 + $0xa0] sm:$0xff]  ;;  %v1276_v30 = vld [vmem:[%s2175_s2 + $0xa8] sm:$0xff] }
 0x135   : > { %v512_v34 = vmul.f32 %v1335_v31, %v1253_v24  ;;  %v1336_v35 = vpop.f32.mrb[4].mxu0  ;;  %v526_v36 = vmax.f32 %v522_v32, 0.0  ;;  %v1516_v32 = vpack.c.bf16 %v1276_v30, %v1275_v29 }
 0x136   : > { %v1337_v37 = vpop.f32.mrb[5].mxu0 }
 0x137   : > { %v523_v40 = vadd.f32 %v1254_v27, %v512_v34  ;;  %v1338_v41 = vadd.f32 %v1337_v37, %v1336_v35  ;;  %1394 = vmatprep.mubr.msk.f32.mxu1 %vm646_vm0, %v526_v36  ;;  %v535_v50 = vrot.slane %v526_v36, 7  ;;  %v548_v51 = vrot.slane %v526_v36, 1  ;;  %v1278_v34 = vld [vmem:[%s2175_s2 + $0xb8] sm:$0xff] }
 0x138   : > { %v562_v35 = vadd.s32 8, %v2021_v42  ;;  %v1520_v36 = vpack.c.bf16 %v1278_v34, %v1277_v33 }
 0x139   : > { %v527_v43 = vmax.f32 %v523_v40, 0.0  ;;  %v513_v44 = vmul.f32 %v1338_v41, %v1253_v24  ;;  %v1339_v45 = vpop.f32.mrb[6].mxu0  ;;  %v546_v10 = vsel %vm534_vm2, 0.0, %v535_v50 }
 0x13a   : > { %v1340_v49 = vpop.f32.mrb[7].mxu0  ;;  %v617_v18 = vsel %vm613_vm3, 0.0, %v546_v10  ;;  %v576_v37 = vand.u32 15, %v562_v35 }
 0x13b   : > { %v536_v59 = vrot.slane %v527_v43, 7  ;;  %v524_v60 = vadd.f32 %v1254_v27, %v513_v44  ;;  %v1341_v61 = vadd.f32 %v1340_v49, %v1339_v45  ;;  %1395 = vmatmul.mubr.msk.f32.vlgmr.msra.gmra.mrb[0].mxu1 %vm646_vm0, %v527_v43  ;;  %v549_v62 = vrot.slane %v527_v43, 1  ;;  %v981_v44 = vld [vmem:[#allocation2 + $0x40] sm:$0xff]  ;;  %v983_v45 = vld [vmem:[#allocation2 + $0x50] sm:$0xff] }
 0x13c   : > { %1495 = vmatpush3.bf16.msra.mxu1 %v1492_v6  ;;  %vm622_vm5 = vcmp.eq.s32.totalorder %v576_v37, 15  ;;  %v1536_v49 = vpack.c.bf16 %v988_v48, %v986_v47 }
 0x13d   : > { %v528_v1 = vmax.f32 %v524_v60, 0.0  ;;  %v514_v2 = vmul.f32 %v1341_v61, %v1253_v24  ;;  %1497 = vmatprep.subr.bf16.mxu1 %v1496_v46  ;;  %v537_v3 = vsel %vm534_vm2, %v535_v50, %v536_v59  ;;  %v550_v4 = vsel %vm547_vm1, %v548_v51, %v549_v62  ;;  %v985_v50 = vld [vmem:[#allocation2 + $0x60] sm:$0xff]  ;;  %v987_v51 = vld [vmem:[#allocation2 + $0x70] sm:$0xff] }
 0x13e   : > { %v1702_v60 = vmov 0.0   ;;  %v1283_v61 = vld [vmem:[%s2179_s6] ss:$0 sm:$0xff] }
 0x13f   : > { %v551_v6 = vrot.slane %v528_v1, 1  ;;  %v525_v8 = vadd.f32 %v1254_v27, %v514_v2  ;;  %1397 = vmatprep.mubr.msk.f32.mxu1 %vm646_vm0, %v528_v1  ;;  %v538_v9 = vrot.slane %v528_v1, 7  ;;  %v1274_v27 = vld [vmem:[%s2175_s2 + $0x98] sm:$0xff]  ;;  %1065 = vmatprep.mubr.f32.mxu0 %v1702_v60 }
 0x140   : > { %1499 = vmatpush3.bf16.msra.mxu1 %v1496_v46  ;;  %v1512_v28 = vpack.c.bf16 %v1274_v27, %v1273_v26  ;;  %v1534_v46 = vpack.c.bf16 %v983_v45, %v981_v44 }
 0x141   : > { %v529_v12 = vmax.f32 %v525_v8, 0.0  ;;  %1501 = vmatprep.subr.bf16.mxu1 %v1500_v63  ;;  %v539_v14 = vsel %vm534_vm2, %v536_v59, %v538_v9  ;;  %v552_v15 = vsel %vm547_vm1, %v549_v62, %v551_v6  ;;  %v1538_v59 = vpack.c.bf16 %v987_v51, %v985_v50 }
 0x142   : > { %v619_v31 = vsel %vm615_vm4, 0.0, %v539_v14  ;;  %v626_v40 = vsel %vm622_vm5, 0.0, %v552_v15  ;;  %1535 = vmatpush1.bf16.msra.mxu0 %v1534_v46  ;;  %v1094_v15 = vsub.s32 0, %v2021_v42 }
 0x143   : > { %1398 = vmatmul.mubr.msk.f32.gmra.mrb[2].mxu1 %vm646_vm0, %v529_v12  ;;  %v540_v19 = vrot.slane %v529_v12, 7  ;;  %v553_v20 = vrot.slane %v529_v12, 1  ;;  %1537 = vmatprep.subr.bf16.mxu0 %v1536_v49 }
 0x144   : > { %1503 = vmatpush3.bf16.msra.mxu1 %v1500_v63  ;;  %1416 = vmatprep.mubr.msk.f32.mxu1 %vm646_vm0, %v617_v18  ;;  %v1284_v63 = vld [vmem:[%s2180_s7] ss:$0 sm:$0xff] }
 0x145   : > { %1505 = vmatprep.subr.bf16.mxu1 %v1504_v13  ;;  %v541_v23 = vsel %vm534_vm2, %v538_v9, %v540_v19  ;;  %v554_v24 = vsel %vm547_vm1, %v551_v6, %v553_v20  ;;  %v559_v41 = vsel %vm547_vm1, %v553_v20, 0.0  ;;  %v1110_v18 = vld [vmem:[%s2182_s9] sm:$0x3]  ;;  %v1095_v19 = vrot.slane %v1090_v16, %v1094_v15 }
 0x146   : > { %v628_v43 = vsel %vm624_vm6, 0.0, %v559_v41  ;;  %1539 = vmatpush1.bf16.msra.mxu0 %v1538_v59  ;;  %v1099_v20 = vrot.slane %v1090_v16, %v1098_v17  ;;  %v1115_v21 = vrot.slane %v1110_v18, %v1094_v15 }
 0x148   : > { %1507 = vmatpush3.bf16.msra.mxu1 %v1504_v13 }
 0x149   : > { %1509 = vmatprep.subr.bf16.mxu1 %v1508_v22 }
 0x14b   : > { %1417 = vmatmul.mubr.msk.f32.vlgmr.msra.gmra.mrb[0].mxu1 %vm646_vm0, %v537_v3 }
 0x14c   : > { %1419 = vmatprep.mubr.msk.f32.mxu1 %vm646_vm0, %v619_v31  ;;  %1511 = vmatpush3.bf16.msra.mxu1 %v1508_v22 }
 0x14d   : > { %1513 = vmatprep.subr.bf16.mxu1 %v1512_v28 }
 0x14f   : > { %1420 = vmatmul.mubr.msk.f32.gmra.mrb[2].mxu1 %vm646_vm0, %v541_v23  ;;  %v1119_v23 = vrot.slane %v1110_v18, %v1098_v17 }
 0x150   : > { %1515 = vmatpush3.bf16.msra.mxu1 %v1512_v28  ;;  %1438 = vmatprep.mubr.msk.f32.mxu1 %vm646_vm0, %v550_v4 }
 0x151   : > { %1517 = vmatprep.subr.bf16.mxu1 %v1516_v32 }
 0x154   : > { %1519 = vmatpush3.bf16.msra.mxu1 %v1516_v32 }
 0x155   : > { %1521 = vmatprep.subr.bf16.mxu1 %v1520_v36 }
 0x158   : > { %1523 = vmatpush3.bf16.msra.mxu1 %v1520_v36 }
 0x15b   : > { %1439 = vmatmul.mubr.msk.f32.vlgmr.msra.gmra.mrb[0].mxu1 %vm646_vm0, %v626_v40 }
 0x15c   : > { %1441 = vmatprep.mubr.msk.f32.mxu1 %vm646_vm0, %v554_v24 }
 0x15f   : > { %1442 = vmatmul.mubr.msk.f32.gmra.mrb[2].mxu1 %vm646_vm0, %v628_v43 }
 0x22e   : > { %v1440_v62 = vpop.f32.mrb[0].mxu1 }
 0x22f   : > { %v924_v0 = vpop.f32.mrb[1].mxu1  ;;  %v955_v1 = vmul.f32 %v1440_v62, %v1283_v61 }
 0x230   : > { %v954_v2 = vmul.f32 %v1283_v61, %v924_v0 }
 0x231   : > { %v966_v7 = vadd.f32 %v1284_v63, %v955_v1 }
 0x232   : > { %v965_v3 = vadd.f32 %v1284_v63, %v954_v2  ;;  %v1443_v4 = vpop.f32.mrb[2].mxu1 }
 0x233   : > { %v934_v5 = vpop.f32.mrb[3].mxu1  ;;  %v970_v9 = vmax.f32 %v966_v7, 0.0  ;;  %v957_v10 = vmul.f32 %v1443_v4, %v1283_v61 }
 0x234   : > { %v969_v6 = vmax.f32 %v965_v3, 0.0  ;;  %v956_v8 = vmul.f32 %v1283_v61, %v934_v5 }
 0x235   : > { %v968_v12 = vadd.f32 %v1284_v63, %v957_v10 }
 0x236   : > { %1285 = vmatmul.mubr.msk.f32.vlgmr.msra.gmra.mrb[8].mxu0 %vm646_vm0, %v969_v6  ;;  %v967_v11 = vadd.f32 %v1284_v63, %v956_v8 }
 0x237   : > { %1071 = vmatprep.mubr.f32.mxu0 %v1702_v60  ;;  %v972_v14 = vmax.f32 %v968_v12, 0.0 }
 0x238   : > { %v971_v13 = vmax.f32 %v967_v11, 0.0 }
 0x23a   : > { %1286 = vmatmul.mubr.msk.f32.gmra.mrb[10].mxu0 %vm646_vm0, %v970_v9 }
 0x23b   : > { %1077 = vmatprep.mubr.f32.mxu0 %v1702_v60 }
 0x23e   : > { %1287 = vmatmul.mubr.msk.f32.gmra.mrb[12].mxu0 %vm646_vm0, %v971_v13 }
 0x23f   : > { %1083 = vmatprep.mubr.f32.mxu0 %v1702_v60 }
 0x242   : > { %1288 = vmatmul.mubr.msk.f32.gmra.mrb[14].mxu0 %vm646_vm0, %v972_v14 }
 0x309   : > { %v1067_v22 = vpop.f32.mrb[8].mxu0 }
 0x30a   : > { %v1102_v24 = vmul.f32 %v1095_v19, %v1067_v22  ;;  %v1069_v26 = vpop.f32.mrb[9].mxu0 }
 0x30b   : > { %v1103_v27 = vmul.f32 %v1099_v20, %v1069_v26 }
 0x30c   : > { %v1122_v28 = vadd.f32 %v1115_v21, %v1102_v24 }
 0x30d   : > { %v1123_v29 = vadd.f32 %v1119_v23, %v1103_v27  ;;  %v1073_v30 = vpop.f32.mrb[10].mxu0 }
 0x30e   : > { %v1130_v42 = vadd.f32 %v1122_v28, %v1957_v52  ;;  %v1104_v31 = vmul.f32 %v1095_v19, %v1073_v30  ;;  %v1075_v32 = vpop.f32.mrb[11].mxu0 }
 0x30f   : > { %v1131_v33 = vadd.f32 %v1123_v29, %v1905_v25  ;;  %v1105_v34 = vmul.f32 %v1099_v20, %v1075_v32 }
 0x310   : > { %v1138_v35 = vmax.f32 %v1130_v42, 0.0  ;;  %v1124_v36 = vadd.f32 %v1115_v21, %v1104_v31 }
 0x311   : > { %v1139_v37 = vmax.f32 %v1131_v33, 0.0  ;;  %v1125_v38 = vadd.f32 %v1119_v23, %v1105_v34  ;;  %v1079_v39 = vpop.f32.mrb[12].mxu0 }
 0x312   : > { %1146 = vst [vmem:[%s2105_s29] sm:$0xff] %v1138_v35  ;;  %v1132_v40 = vadd.f32 %v1124_v36, %v1965_v54  ;;  %v1106_v52 = vmul.f32 %v1095_v19, %v1079_v39  ;;  %v1081_v41 = vpop.f32.mrb[13].mxu0 }
 0x313   : > { %1147 = vst [vmem:[%s2105_s29 + $0x8] sm:$0xff] %v1139_v37  ;;  %v1133_v25 = vadd.f32 %v1125_v38, %v1960_v53  ;;  %v1107_v43 = vmul.f32 %v1099_v20, %v1081_v41 }
 0x314   : > { %v1140_v44 = vmax.f32 %v1132_v40, 0.0  ;;  %v1126_v45 = vadd.f32 %v1115_v21, %v1106_v52 }
 0x315   : > { %v1141_v46 = vmax.f32 %v1133_v25, 0.0  ;;  %v1127_v47 = vadd.f32 %v1119_v23, %v1107_v43  ;;  %v1085_v48 = vpop.f32.mrb[14].mxu0 }
 0x316   : > { %1148 = vst [vmem:[%s2105_s29 + $0x10] sm:$0xff] %v1140_v44  ;;  %v1134_v49 = vadd.f32 %v1126_v45, %v1973_v56  ;;  %v1108_v50 = vmul.f32 %v1095_v19, %v1085_v48  ;;  %v1087_v54 = vpop.f32.mrb[15].mxu0 }
 0x317   : > { %1149 = vst [vmem:[%s2105_s29 + $0x18] sm:$0xff] %v1141_v46  ;;  %v1135_v51 = vadd.f32 %v1127_v47, %v1968_v55  ;;  %v1109_v53 = vmul.f32 %v1099_v20, %v1087_v54 }
 0x318   : > { %v1142_v59 = vmax.f32 %v1134_v49, 0.0  ;;  %v1128_v60 = vadd.f32 %v1115_v21, %v1108_v50 }
 0x319   : > { %v1143_v61 = vmax.f32 %v1135_v51, 0.0  ;;  %v1129_v62 = vadd.f32 %v1119_v23, %v1109_v53 }
 0x31a   : > { %1150 = vst [vmem:[%s2105_s29 + $0x20] sm:$0xff] %v1142_v59  ;;  %v1136_v63 = vadd.f32 %v1128_v60, %v1981_v58 }
 0x31b   : > { %1151 = vst [vmem:[%s2105_s29 + $0x28] sm:$0xff] %v1143_v61  ;;  %v1137_v56 = vadd.f32 %v1129_v62, %v1976_v57 }
 0x31c   : > { %v1144_v0 = vmax.f32 %v1136_v63, 0.0 }
 0x31d   : > { %v1145_v55 = vmax.f32 %v1137_v56, 0.0 }
 0x31e   : > { %1152 = vst [vmem:[%s2105_s29 + $0x30] sm:$0xff] %v1144_v0 }
 0x31f   : > { %1153 = vst [vmem:[%s2105_s29 + $0x38] sm:$0xff] %v1145_v55 }
 0x320   : > { %1644 = shalt.err (!%p1641_p7)
}
 0x321   : > { %s1645_s27 = scalar_lea.hbm %s2124_s11, 1024  ;;  %s1649_s30 = scalar_lea.hbm %s2183_s10, 2048 }
 0x322   : > { %p1646_p8 = scmp.ne.s32.totalorder %s2124_s11, %s1645_s27  ;;  %p1650_p1 = scmp.lt.u32.totalorder %s2124_s11, %s2183_s10 }
 0x323   : > { %p1651_p0 = scmp.lt.u32.totalorder %s1649_s30, %s1645_s27  ;;  %p1653_p6 = scmp.lt.u32.totalorder %s1645_s27, %s2124_s11 }
 0x324   : > { %p1647_p11 = pnand %p1646_p8, %p2196_p9 }
 0x325   : > { %p1652_p5 = por %p1651_p0, %p1650_p1 }
 0x326   : > { %p1648_p13 = pneg %p1647_p11 }
 0x327   : > { %p1654_p10 = por %p1653_p6, %p1652_p5 }
 0x329   : > { %p1655_p12 = pnand %p1654_p10, %p1648_p13 }
 0x32b   : > { %1658 = shalt.err (!%p1655_p12)
}
 0x32c   : > { %s1704_s21 = smov 256   ;;  %s1705_s28 = smov 16  }
 0x32d   : > { %1552 = dma.vmem_to_hbm [thread:$0]  (%p2196_p9), %s2126_s20, 1024, %s2124_s11, %s2132_s17, %s1704_s21, %s1704_s21, %s1705_s28  }
 0x32e PF: > { %p1564_p2 = scmp.ge.s32.totalorder %s1697_s16, 2  ;;  %s1184_s26 = sand.u32 1, %s1685_s13  }
 0x32f   : > { %p2197_p3 = scmp.ne.s32.totalorder %s2189_s24, 0  ;;  %s1185_s3 = scalar_lea.sflag [#allocation4], %s1184_s26 }
 0x331   : > { %p1559_p4 = pnand %p1564_p2, %p2197_p3 }
 0x333   : > { %1680 = dma.done.wait (!%p1559_p4), %s1185_s3, 1024  }
 0x334   : > { %1682 = vsyncadd (!%p1559_p4), %s1185_s3, 4294966272  ;;  %p21_p7 = scmp.ge.s32.totalorder %s1786_s19, 4   ;;  %s2198_s13 = smov %s1689_s14 }
 0x335   : > { %s2199_s14 = smov %s1693_s15  ;;  %s2200_s15 = smov %s1797_s22 }
 0x336   : > { %s2201_s16 = smov %s1786_s19  ;;  %23 = sbr.rel (!%p21_p7) target bundleno = 6 (0x6), region = 102 }
 0x33d   :  { %1190 = vsyncpa [#allocation3], 1 }
 0x33e   :  { %1192 = vsyncpa [#allocation3 + $0x1], 1 }
 0x33f   :  { %1193 = vsyncpa [#allocation4], 1 }
 0x340   :  { %1195 = vsyncpa [#allocation4 + $0x1], 1 }

</bundles_post_ra>
